<compile_context>
chip_gen: v5e
topology: v5e:2x2
jax: 0.10.0
libtpu: 0.0.40
codegen_flags: <defaults>
</compile_context>

<pallas_src>
import math
from functools import partial

import jax
import jax.numpy as jnp
from jax import lax
from jax.experimental import pallas as pl
from jax.experimental.pallas import tpu as pltpu

# ---------------- configuration (small, consistent with the module) ----------
WORD_DIM = 32                      # word_dim
NUM_HEADS = 4                      # num_heads
HEAD_DIM = WORD_DIM // NUM_HEADS   # 8
Q_LEN = 8                          # query_length
KEY_LEN = 22                       # key_len (doc length), divisible by 11
WIN_LEN = 11
NUM_WIN = KEY_LEN // WIN_LEN       # 2
BATCH = 2
VOCAB = 50
QUERY_SCALE = HEAD_DIM ** (-0.5)
SQRT_D = math.sqrt(WORD_DIM)

Q_ROWS = BATCH * Q_LEN                     # 16 projected query rows
D_ROWS = BATCH * KEY_LEN                   # 44 projected doc rows per doc
GROUPS = BATCH * NUM_WIN * NUM_HEADS       # 16 (b, w, h) attention slices per doc
OUT_LANES = 4 * WORD_DIM                   # 128: lane-dense output width
OUT_ROWS = (2 * BATCH * NUM_WIN * Q_LEN * WORD_DIM) // OUT_LANES   # 16


def _full_spec(shape):
    return pl.BlockSpec(tuple(shape), lambda *_: (0,) * len(shape))


# --------------------------- kernel 1: projection -----------------------------
def _proj_kernel(pe_flag,
                 qe_ref, qm_ref, dpe_ref, dpm_ref, dne_ref, dnm_ref,
                 pe_ref, w_ref, d_out_ref, q_out_ref):
    w = w_ref[...]                                       # nn.Linear weight [out, in]

    def project(x):                                      # x @ W^T
        return lax.dot_general(x, w, (((1,), (1,)), ((), ())),
                               preferred_element_type=jnp.float32)

    # q = emb(q) * q_mask  (mask before linear, no PE — as in the reference)
    q = qe_ref[...] * qm_ref[...]                        # [16, 32]
    dp = dpe_ref[...]                                    # [44, 32]
    dn = dne_ref[...]
    if pe_flag:                                          # PositionalEncoding
        pe = pe_ref[...]                                 # [44, 32] (tiled per batch)
        dp = dp * SQRT_D + pe
        dn = dn * SQRT_D + pe
    dp = dp * dpm_ref[...]                               # masks applied after PE
    dn = dn * dnm_ref[...]

    d_out_ref[0] = project(dp)                           # d_pos projection
    d_out_ref[1] = project(dn)                           # d_neg projection
    q_out_ref[...] = project(q)


def _fused_projection(q_emb, q_mask, dp_emb, dp_mask, dn_emb, dn_mask, pe, w_t,
                      pe_flag):
    return pl.pallas_call(
        partial(_proj_kernel, pe_flag),
        out_shape=(jax.ShapeDtypeStruct((2, D_ROWS, WORD_DIM), jnp.float32),
                   jax.ShapeDtypeStruct((Q_ROWS, WORD_DIM), jnp.float32)),
        grid=(1,),
        in_specs=[_full_spec(q_emb.shape), _full_spec(q_mask.shape),
                  _full_spec(dp_emb.shape), _full_spec(dp_mask.shape),
                  _full_spec(dn_emb.shape), _full_spec(dn_mask.shape),
                  _full_spec(pe.shape), _full_spec(w_t.shape)],
        out_specs=(_full_spec((2, D_ROWS, WORD_DIM)),
                   _full_spec((Q_ROWS, WORD_DIM))),
    )(q_emb, q_mask, dp_emb, dp_mask, dn_emb, dn_mask, pe, w_t)


# --------------------------- kernel 2: attention -------------------------------
def _attention_kernel(q_ref, d_ref, o_ref):
    # q_ref: [B, H, Lq, dk] (shared by both docs and all windows)
    # d_ref: [1, G, 11, dk] for the current doc (grid axis = {pos, neg})
    q = q_ref[...] * QUERY_SCALE
    d = d_ref[0]                                                     # [G, 11, dk]
    # broadcast the query over windows in-register (no HBM materialization)
    qg = jnp.broadcast_to(
        q[:, None], (BATCH, NUM_WIN, NUM_HEADS, Q_LEN, HEAD_DIM)
    ).reshape(GROUPS, Q_LEN, HEAD_DIM)
    logits = jnp.einsum('gqd,gkd->gqk', qg, d,
                        preferred_element_type=jnp.float32)          # [G, Lq, 11]
    m = jnp.max(logits, axis=-1, keepdims=True)
    e = jnp.exp(logits - m)
    s = jnp.sum(e, axis=-1, keepdims=True)
    weights = e * pl.reciprocal(s, approx=True)   # softmax; dropout(p=0) is identity
    # context = softmax(qK^T) @ K  (the doc is reused as values, as in the reference)
    o_ref[0] = jnp.einsum('gqk,gkd->gqd', weights, d,
                          preferred_element_type=jnp.float32)        # [G, Lq, dk]


def _fused_attention(q_heads, d_heads):
    return pl.pallas_call(
        _attention_kernel,
        out_shape=jax.ShapeDtypeStruct((2, GROUPS, Q_LEN, HEAD_DIM), jnp.float32),
        grid=(2,),
        in_specs=[pl.BlockSpec((BATCH, NUM_HEADS, Q_LEN, HEAD_DIM),
                               lambda g: (0, 0, 0, 0)),
                  pl.BlockSpec((1, GROUPS, WIN_LEN, HEAD_DIM),
                               lambda g: (g, 0, 0, 0))],
        out_specs=pl.BlockSpec((1, GROUPS, Q_LEN, HEAD_DIM),
                               lambda g: (g, 0, 0, 0)),
        compiler_params=pltpu.CompilerParams(
            dimension_semantics=("parallel",)),   # pos/neg on separate TCs on v7x
    )(q_heads, d_heads)


# ------------------------ kernel 3: output linear -------------------------------
def _output_linear_kernel(x_ref, w_ref, o_ref):
    o_ref[...] = jnp.dot(x_ref[...], w_ref[...],
                         preferred_element_type=jnp.float32)


def _fused_output_linear(ctx_flat, w_block):
    return pl.pallas_call(
        _output_linear_kernel,
        out_shape=jax.ShapeDtypeStruct((OUT_ROWS, OUT_LANES), jnp.float32),
        grid=(1,),
        in_specs=[_full_spec((OUT_ROWS, OUT_LANES)),
                  _full_spec((OUT_LANES, OUT_LANES))],
        out_specs=_full_spec((OUT_ROWS, OUT_LANES)),
    )(ctx_flat, w_block)


# ---------------------------- module forward ----------------------------------
def build_positional_encoding(doc_len, word_dim):
    position = jnp.arange(doc_len, dtype=jnp.float32)[:, None]
    div_term = jnp.exp(jnp.arange(0, word_dim, 2, dtype=jnp.float32)
                       * -(math.log(10000.0) / word_dim))
    pe = jnp.zeros((doc_len, word_dim), jnp.float32)
    pe = pe.at[:, 0::2].set(jnp.sin(position * div_term))
    pe = pe.at[:, 1::2].set(jnp.cos(position * div_term))
    return pe


@partial(jax.jit, static_argnames=("pe_flag",))
def multi_head_attention_forward(params, q_ids, d_pos_ids, d_neg_ids,
                                 q_mask, d_pos_mask, d_neg_mask, pe_flag=True):
    emb = params["embedding"]      # [VOCAB, D]   (emb_mod)
    w_t = params["linear_trans"]   # [D, D]       nn.Linear weight ([out, in])
    w_o = params["output_linear"]  # [D, D]
    pe = params["pe"]              # [KEY_LEN, D]

    # TODO(synk): embedding gather stays in XLA (no robust in-kernel dynamic gather).
    q_emb = jnp.take(emb, q_ids, axis=0)        # [B, Lq, D]
    dp_emb = jnp.take(emb, d_pos_ids, axis=0)   # [B, Ld, D]
    dn_emb = jnp.take(emb, d_neg_ids, axis=0)

    # --- kernel 1: masked / PE'd linear_trans projection (one launch) --------
    pe_tiled = jnp.tile(pe, (BATCH, 1))         # PE per (batch, position) row
    d_proj, q_proj = _fused_projection(
        q_emb.reshape(Q_ROWS, WORD_DIM), q_mask.reshape(Q_ROWS, 1),
        dp_emb.reshape(D_ROWS, WORD_DIM), d_pos_mask.reshape(D_ROWS, 1),
        dn_emb.reshape(D_ROWS, WORD_DIM), d_neg_mask.reshape(D_ROWS, 1),
        pe_tiled, w_t, pe_flag)

    # torch-.view head split == row-major re-indexing of contiguous buffers (free).
    q_heads = q_proj.reshape(BATCH, NUM_HEADS, Q_LEN, HEAD_DIM)    # [B,H,Lq,dk]
    d_heads = d_proj.reshape(2, GROUPS, WIN_LEN, HEAD_DIM)         # [doc,(b,w,h),11,dk]

    # --- kernel 2: all 16 head slices per doc in one batched block -----------
    ctx = _fused_attention(q_heads, d_heads)                       # [2, G, Lq, dk]

    # torch-.view head merge == row-major re-indexing (free); present a
    # lane-dense [16, 128] slab to the output-linear kernel.
    ctx_flat = ctx.reshape(OUT_ROWS, OUT_LANES)

    # --- kernel 3: output_linear for both docs, lane-dense output ------------
    # block-diagonal replication of W_o^T: [16,128] @ [128,128] on the MXU is
    # mathematically identical to ([64,32] @ W_o^T) but with full-lane stores.
    w_block = jnp.kron(jnp.eye(4, dtype=w_o.dtype), w_o.T)         # [128, 128]
    out = _fused_output_linear(ctx_flat, w_block)                  # [16, 128]

    out = out.reshape(2, BATCH, NUM_WIN, Q_LEN, WORD_DIM)
    return out[0], out[1]


# ---------------------------------- main ---------------------------------------
if __name__ == "__main__":
    key = jax.random.PRNGKey(0)
    k1, k2, k3, k4, k5, k6, k7, k8 = jax.random.split(key, 8)

    bound = 1.0 / math.sqrt(WORD_DIM)
    params = {
        "embedding": jax.random.normal(k1, (VOCAB, WORD_DIM), jnp.float32),
        "linear_trans": jax.random.uniform(k2, (WORD_DIM, WORD_DIM),
                                           jnp.float32, -bound, bound),
        "output_linear": jax.random.uniform(k3, (WORD_DIM, WORD_DIM),
                                            jnp.float32, -bound, bound),
        "pe": build_positional_encoding(KEY_LEN, WORD_DIM),
    }

    q_ids = jax.random.randint(k4, (BATCH, Q_LEN), 0, VOCAB)
    d_pos_ids = jax.random.randint(k5, (BATCH, KEY_LEN), 0, VOCAB)
    d_neg_ids = jax.random.randint(k6, (BATCH, KEY_LEN), 0, VOCAB)
    q_mask = (jax.random.uniform(k7, (BATCH, Q_LEN, 1)) > 0.2).astype(jnp.float32)
    d_pos_mask = (jax.random.uniform(k8, (BATCH, KEY_LEN, 1)) > 0.2).astype(jnp.float32)
    d_neg_mask = jnp.ones((BATCH, KEY_LEN, 1), jnp.float32)

    out_pos, out_neg = multi_head_attention_forward(
        params, q_ids, d_pos_ids, d_neg_ids,
        q_mask, d_pos_mask, d_neg_mask, pe_flag=True)

    jax.block_until_ready((out_pos, out_neg))
    assert out_pos.shape == (BATCH, NUM_WIN, Q_LEN, WORD_DIM)
    assert out_neg.shape == (BATCH, NUM_WIN, Q_LEN, WORD_DIM)
    print("KERNEL_OK")
</pallas_src>

<mosaic_0001>
module attributes {stable_mosaic.version = 11 : i64} {
  func.func @_attention_kernel(%arg0: i32, %arg1: memref<2x4x8x8xf32, #tpu.memory_space<vmem>>, %arg2: memref<1x16x11x8xf32, #tpu.memory_space<vmem>>, %arg3: memref<1x16x8x8xf32, #tpu.memory_space<vmem>>) attributes {dimension_semantics = [#tpu.dimension_semantics<parallel>], iteration_bounds = array<i64: 2>, scalar_prefetch = 0 : i64, scratch_operands = 0 : i64, tpu.core_type = #tpu.core_type<tc>, window_params = [{pipeline_mode = #tpu.pipeline_mode<synchronous>, transform_indices = @transform_0, window_bounds = array<i64: 2, 4, 8, 8>}, {transform_indices = @transform_1, window_bounds = array<i64: 1, 16, 11, 8>}, {transform_indices = @transform_2, window_bounds = array<i64: 1, 16, 8, 8>}]} {
    %c0 = arith.constant 0 : index
    %c0_0 = arith.constant 0 : index
    %c0_1 = arith.constant 0 : index
    %c0_2 = arith.constant 0 : index
    %0 = vector.load %arg1[%c0, %c0_0, %c0_1, %c0_2] : memref<2x4x8x8xf32, #tpu.memory_space<vmem>>, vector<2x4x8x8xf32>
    %cst = arith.constant 0.353553385 : f32
    %1 = vector.broadcast %cst : f32 to vector<2x4x8x8xf32>
    %2 = arith.mulf %0, %1 : vector<2x4x8x8xf32>
    %c0_3 = arith.constant 0 : index
    %c0_4 = arith.constant 0 : index
    %c0_5 = arith.constant 0 : index
    %c0_6 = arith.constant 0 : index
    %3 = vector.load %arg2[%c0_3, %c0_4, %c0_5, %c0_6] : memref<1x16x11x8xf32, #tpu.memory_space<vmem>>, vector<1x16x11x8xf32>
    %4 = vector.shape_cast %3 : vector<1x16x11x8xf32> to vector<16x11x8xf32>
    %5 = vector.shape_cast %2 : vector<2x4x8x8xf32> to vector<2x1x4x8x8xf32>
    %6 = vector.shape_cast %5 : vector<2x1x4x8x8xf32> to vector<2x1x4x8x8xf32>
    %7 = vector.broadcast %6 : vector<2x1x4x8x8xf32> to vector<2x2x4x8x8xf32>
    %8 = vector.shape_cast %7 : vector<2x2x4x8x8xf32> to vector<16x8x8xf32>
    "tpu.trace_start"() <{level = 10 : i32, message = "gqd,gkd->gqk"}> : () -> ()
    %cst_7 = arith.constant dense<0.000000e+00> : vector<16x8x11xf32>
    %9 = tpu.matmul %8, %4, %cst_7 {dimension_numbers = #tpu.dot_dimension_numbers<[2], [2], [1], [1], [0, 0, 0, 1, 1, 1], [0], [0]>} : vector<16x8x8xf32>, vector<16x11x8xf32>, vector<16x8x11xf32> -> vector<16x8x11xf32>
    "tpu.trace_stop"() : () -> ()
    %cst_8 = arith.constant dense<0xFF800000> : vector<16x8xf32>
    %10 = vector.multi_reduction <maximumf>, %9, %cst_8 [2] : vector<16x8x11xf32> to vector<16x8xf32>
    %11 = vector.shape_cast %10 : vector<16x8xf32> to vector<16x8x1xf32>
    %12 = vector.broadcast %11 : vector<16x8x1xf32> to vector<16x8x11xf32>
    %13 = arith.subf %9, %12 : vector<16x8x11xf32>
    %14 = math.exp %13 : vector<16x8x11xf32>
    %cst_9 = arith.constant dense<0.000000e+00> : vector<16x8xf32>
    %15 = vector.multi_reduction <add>, %14, %cst_9 [2] : vector<16x8x11xf32> to vector<16x8xf32>
    %16 = vector.shape_cast %15 : vector<16x8xf32> to vector<16x8x1xf32>
    %17 = tpu.reciprocal %16 {approx = true} : vector<16x8x1xf32> -> vector<16x8x1xf32>
    %18 = vector.broadcast %17 : vector<16x8x1xf32> to vector<16x8x11xf32>
    %19 = arith.mulf %14, %18 : vector<16x8x11xf32>
    "tpu.trace_start"() <{level = 10 : i32, message = "gqk,gkd->gqd"}> : () -> ()
    %cst_10 = arith.constant dense<0.000000e+00> : vector<16x8x8xf32>
    %20 = tpu.matmul %19, %4, %cst_10 {dimension_numbers = #tpu.dot_dimension_numbers<[2], [1], [1], [2], [0, 0, 0, 1, 1, 2], [0], [0]>} : vector<16x8x11xf32>, vector<16x11x8xf32>, vector<16x8x8xf32> -> vector<16x8x8xf32>
    "tpu.trace_stop"() : () -> ()
    %c0_11 = arith.constant 0 : index
    %c0_12 = arith.constant 0 : index
    %c0_13 = arith.constant 0 : index
    %c0_14 = arith.constant 0 : index
    %21 = vector.load %arg3[%c0_11, %c0_12, %c0_13, %c0_14] : memref<1x16x8x8xf32, #tpu.memory_space<vmem>>, vector<1x16x8x8xf32>
    %22 = vector.shape_cast %21 : vector<1x16x8x8xf32> to vector<16x8x8xf32>
    %23 = vector.shape_cast %20 : vector<16x8x8xf32> to vector<1x16x8x8xf32>
    tpu.vector_store %arg3[%c0_11, %c0_12, %c0_13, %c0_14], %23 {strides = array<i32>} : memref<1x16x8x8xf32, #tpu.memory_space<vmem>>, vector<1x16x8x8xf32>,
    return
  }
  func.func @transform_0(%arg0: i32) -> (i32, i32, i32, i32) {
    %c0_i32 = arith.constant 0 : i32
    %c0_i32_0 = arith.constant 0 : i32
    %c0_i32_1 = arith.constant 0 : i32
    %c0_i32_2 = arith.constant 0 : i32
    %c0_i32_3 = arith.constant 0 : i32
    return %c0_i32, %c0_i32_0, %c0_i32_1, %c0_i32_2 : i32, i32, i32, i32
  }
  func.func @transform_1(%arg0: i32) -> (i32, i32, i32, i32) {
    %c0_i32 = arith.constant 0 : i32
    %c0_i32_0 = arith.constant 0 : i32
    %c0_i32_1 = arith.constant 0 : i32
    %c0_i32_2 = arith.constant 0 : i32
    return %arg0, %c0_i32, %c0_i32_0, %c0_i32_1 : i32, i32, i32, i32
  }
  func.func @transform_2(%arg0: i32) -> (i32, i32, i32, i32) {
    %c0_i32 = arith.constant 0 : i32
    %c0_i32_0 = arith.constant 0 : i32
    %c0_i32_1 = arith.constant 0 : i32
    %c0_i32_2 = arith.constant 0 : i32
    return %arg0, %c0_i32, %c0_i32_0, %c0_i32_1 : i32, i32, i32, i32
  }
}

module attributes {stable_mosaic.version = 11 : i64} {
  func.func @_proj_kernel(%arg0: i32, %arg1: memref<16x32xf32, #tpu.memory_space<vmem>>, %arg2: memref<16x1xf32, #tpu.memory_space<vmem>>, %arg3: memref<44x32xf32, #tpu.memory_space<vmem>>, %arg4: memref<44x1xf32, #tpu.memory_space<vmem>>, %arg5: memref<44x32xf32, #tpu.memory_space<vmem>>, %arg6: memref<44x1xf32, #tpu.memory_space<vmem>>, %arg7: memref<44x32xf32, #tpu.memory_space<vmem>>, %arg8: memref<32x32xf32, #tpu.memory_space<vmem>>, %arg9: memref<2x44x32xf32, #tpu.memory_space<vmem>>, %arg10: memref<16x32xf32, #tpu.memory_space<vmem>>) attributes {dimension_semantics = [#tpu.dimension_semantics<arbitrary>], iteration_bounds = array<i64: 1>, scalar_prefetch = 0 : i64, scratch_operands = 0 : i64, tpu.core_type = #tpu.core_type<tc>, window_params = [{pipeline_mode = #tpu.pipeline_mode<synchronous>, transform_indices = @transform_0, window_bounds = array<i64: 16, 32>}, {pipeline_mode = #tpu.pipeline_mode<synchronous>, transform_indices = @transform_1, window_bounds = array<i64: 16, 1>}, {pipeline_mode = #tpu.pipeline_mode<synchronous>, transform_indices = @transform_2, window_bounds = array<i64: 44, 32>}, {pipeline_mode = #tpu.pipeline_mode<synchronous>, transform_indices = @transform_3, window_bounds = array<i64: 44, 1>}, {pipeline_mode = #tpu.pipeline_mode<synchronous>, transform_indices = @transform_4, window_bounds = array<i64: 44, 32>}, {pipeline_mode = #tpu.pipeline_mode<synchronous>, transform_indices = @transform_5, window_bounds = array<i64: 44, 1>}, {pipeline_mode = #tpu.pipeline_mode<synchronous>, transform_indices = @transform_6, window_bounds = array<i64: 44, 32>}, {pipeline_mode = #tpu.pipeline_mode<synchronous>, transform_indices = @transform_7, window_bounds = array<i64: 32, 32>}, {pipeline_mode = #tpu.pipeline_mode<synchronous>, transform_indices = @transform_8, window_bounds = array<i64: 2, 44, 32>}, {pipeline_mode = #tpu.pipeline_mode<synchronous>, transform_indices = @transform_9, window_bounds = array<i64: 16, 32>}]} {
    %c0 = arith.constant 0 : index
    %c0_0 = arith.constant 0 : index
    %0 = vector.load %arg8[%c0, %c0_0] : memref<32x32xf32, #tpu.memory_space<vmem>>, vector<32x32xf32>
    %c0_1 = arith.constant 0 : index
    %c0_2 = arith.constant 0 : index
    %1 = vector.load %arg1[%c0_1, %c0_2] : memref<16x32xf32, #tpu.memory_space<vmem>>, vector<16x32xf32>
    %c0_3 = arith.constant 0 : index
    %c0_4 = arith.constant 0 : index
    %2 = vector.load %arg2[%c0_3, %c0_4] : memref<16x1xf32, #tpu.memory_space<vmem>>, vector<16x1xf32>
    %3 = vector.broadcast %2 : vector<16x1xf32> to vector<16x32xf32>
    %4 = arith.mulf %1, %3 : vector<16x32xf32>
    %c0_5 = arith.constant 0 : index
    %c0_6 = arith.constant 0 : index
    %5 = vector.load %arg3[%c0_5, %c0_6] : memref<44x32xf32, #tpu.memory_space<vmem>>, vector<44x32xf32>
    %c0_7 = arith.constant 0 : index
    %c0_8 = arith.constant 0 : index
    %6 = vector.load %arg5[%c0_7, %c0_8] : memref<44x32xf32, #tpu.memory_space<vmem>>, vector<44x32xf32>
    %c0_9 = arith.constant 0 : index
    %c0_10 = arith.constant 0 : index
    %7 = vector.load %arg7[%c0_9, %c0_10] : memref<44x32xf32, #tpu.memory_space<vmem>>, vector<44x32xf32>
    %cst = arith.constant 5.65685415 : f32
    %8 = vector.broadcast %cst : f32 to vector<44x32xf32>
    %9 = arith.mulf %5, %8 : vector<44x32xf32>
    %10 = arith.addf %9, %7 : vector<44x32xf32>
    %cst_11 = arith.constant 5.65685415 : f32
    %11 = vector.broadcast %cst_11 : f32 to vector<44x32xf32>
    %12 = arith.mulf %6, %11 : vector<44x32xf32>
    %13 = arith.addf %12, %7 : vector<44x32xf32>
    %c0_12 = arith.constant 0 : index
    %c0_13 = arith.constant 0 : index
    %14 = vector.load %arg4[%c0_12, %c0_13] : memref<44x1xf32, #tpu.memory_space<vmem>>, vector<44x1xf32>
    %15 = vector.broadcast %14 : vector<44x1xf32> to vector<44x32xf32>
    %16 = arith.mulf %10, %15 : vector<44x32xf32>
    %c0_14 = arith.constant 0 : index
    %c0_15 = arith.constant 0 : index
    %17 = vector.load %arg6[%c0_14, %c0_15] : memref<44x1xf32, #tpu.memory_space<vmem>>, vector<44x1xf32>
    %18 = vector.broadcast %17 : vector<44x1xf32> to vector<44x32xf32>
    %19 = arith.mulf %13, %18 : vector<44x32xf32>
    %cst_16 = arith.constant dense<0.000000e+00> : vector<44x32xf32>
    %20 = tpu.matmul %16, %0, %cst_16 {dimension_numbers = #tpu.dot_dimension_numbers<[1], [1], [0], [0], [0, 0, 1, 0], [], []>} : vector<44x32xf32>, vector<32x32xf32>, vector<44x32xf32> -> vector<44x32xf32>
    %c0_17 = arith.constant 0 : index
    %c0_18 = arith.constant 0 : index
    %c0_19 = arith.constant 0 : index
    %21 = vector.load %arg9[%c0_17, %c0_18, %c0_19] : memref<2x44x32xf32, #tpu.memory_space<vmem>>, vector<1x44x32xf32>
    %22 = vector.shape_cast %21 : vector<1x44x32xf32> to vector<44x32xf32>
    %23 = vector.shape_cast %20 : vector<44x32xf32> to vector<1x44x32xf32>
    tpu.vector_store %arg9[%c0_17, %c0_18, %c0_19], %23 {strides = array<i32>} : memref<2x44x32xf32, #tpu.memory_space<vmem>>, vector<1x44x32xf32>,
    %cst_20 = arith.constant dense<0.000000e+00> : vector<44x32xf32>
    %24 = tpu.matmul %19, %0, %cst_20 {dimension_numbers = #tpu.dot_dimension_numbers<[1], [1], [0], [0], [0, 0, 1, 0], [], []>} : vector<44x32xf32>, vector<32x32xf32>, vector<44x32xf32> -> vector<44x32xf32>
    %c1 = arith.constant 1 : index
    %c0_21 = arith.constant 0 : index
    %c0_22 = arith.constant 0 : index
    %25 = vector.load %arg9[%c1, %c0_21, %c0_22] : memref<2x44x32xf32, #tpu.memory_space<vmem>>, vector<1x44x32xf32>
    %26 = vector.shape_cast %25 : vector<1x44x32xf32> to vector<44x32xf32>
    %27 = vector.shape_cast %24 : vector<44x32xf32> to vector<1x44x32xf32>
    tpu.vector_store %arg9[%c1, %c0_21, %c0_22], %27 {strides = array<i32>} : memref<2x44x32xf32, #tpu.memory_space<vmem>>, vector<1x44x32xf32>,
    %cst_23 = arith.constant dense<0.000000e+00> : vector<16x32xf32>
    %28 = tpu.matmul %4, %0, %cst_23 {dimension_numbers = #tpu.dot_dimension_numbers<[1], [1], [0], [0], [0, 0, 1, 0], [], []>} : vector<16x32xf32>, vector<32x32xf32>, vector<16x32xf32> -> vector<16x32xf32>
    %c0_24 = arith.constant 0 : index
    %c0_25 = arith.constant 0 : index
    %29 = vector.load %arg10[%c0_24, %c0_25] : memref<16x32xf32, #tpu.memory_space<vmem>>, vector<16x32xf32>
    tpu.vector_store %arg10[%c0_24, %c0_25], %28 {strides = array<i32>} : memref<16x32xf32, #tpu.memory_space<vmem>>, vector<16x32xf32>,
    return
  }
  func.func @transform_0(%arg0: i32) -> (i32, i32) {
    %c0_i32 = arith.constant 0 : i32
    %c0_i32_0 = arith.constant 0 : i32
    %c0_i32_1 = arith.constant 0 : i32
    return %c0_i32, %c0_i32_0 : i32, i32
  }
  func.func @transform_1(%arg0: i32) -> (i32, i32) {
    %c0_i32 = arith.constant 0 : i32
    %c0_i32_0 = arith.constant 0 : i32
    %c0_i32_1 = arith.constant 0 : i32
    return %c0_i32, %c0_i32_0 : i32, i32
  }
  func.func @transform_2(%arg0: i32) -> (i32, i32) {
    %c0_i32 = arith.constant 0 : i32
    %c0_i32_0 = arith.constant 0 : i32
    %c0_i32_1 = arith.constant 0 : i32
    return %c0_i32, %c0_i32_0 : i32, i32
  }
  func.func @transform_3(%arg0: i32) -> (i32, i32) {
    %c0_i32 = arith.constant 0 : i32
    %c0_i32_0 = arith.constant 0 : i32
    %c0_i32_1 = arith.constant 0 : i32
    return %c0_i32, %c0_i32_0 : i32, i32
  }
  func.func @transform_4(%arg0: i32) -> (i32, i32) {
    %c0_i32 = arith.constant 0 : i32
    %c0_i32_0 = arith.constant 0 : i32
    %c0_i32_1 = arith.constant 0 : i32
    return %c0_i32, %c0_i32_0 : i32, i32
  }
  func.func @transform_5(%arg0: i32) -> (i32, i32) {
    %c0_i32 = arith.constant 0 : i32
    %c0_i32_0 = arith.constant 0 : i32
    %c0_i32_1 = arith.constant 0 : i32
    return %c0_i32, %c0_i32_0 : i32, i32
  }
  func.func @transform_6(%arg0: i32) -> (i32, i32) {
    %c0_i32 = arith.constant 0 : i32
    %c0_i32_0 = arith.constant 0 : i32
    %c0_i32_1 = arith.constant 0 : i32
    return %c0_i32, %c0_i32_0 : i32, i32
  }
  func.func @transform_7(%arg0: i32) -> (i32, i32) {
    %c0_i32 = arith.constant 0 : i32
    %c0_i32_0 = arith.constant 0 : i32
    %c0_i32_1 = arith.constant 0 : i32
    return %c0_i32, %c0_i32_0 : i32, i32
  }
  func.func @transform_8(%arg0: i32) -> (i32, i32, i32) {
    %c0_i32 = arith.constant 0 : i32
    %c0_i32_0 = arith.constant 0 : i32
    %c0_i32_1 = arith.constant 0 : i32
    %c0_i32_2 = arith.constant 0 : i32
    return %c0_i32, %c0_i32_0, %c0_i32_1 : i32, i32, i32
  }
  func.func @transform_9(%arg0: i32) -> (i32, i32) {
    %c0_i32 = arith.constant 0 : i32
    %c0_i32_0 = arith.constant 0 : i32
    %c0_i32_1 = arith.constant 0 : i32
    return %c0_i32, %c0_i32_0 : i32, i32
  }
}

module attributes {stable_mosaic.version = 11 : i64} {
  func.func @_output_linear_kernel(%arg0: i32, %arg1: memref<16x128xf32, #tpu.memory_space<vmem>>, %arg2: memref<128x128xf32, #tpu.memory_space<vmem>>, %arg3: memref<16x128xf32, #tpu.memory_space<vmem>>) attributes {dimension_semantics = [#tpu.dimension_semantics<arbitrary>], iteration_bounds = array<i64: 1>, scalar_prefetch = 0 : i64, scratch_operands = 0 : i64, tpu.core_type = #tpu.core_type<tc>, window_params = [{pipeline_mode = #tpu.pipeline_mode<synchronous>, transform_indices = @transform_0, window_bounds = array<i64: 16, 128>}, {pipeline_mode = #tpu.pipeline_mode<synchronous>, transform_indices = @transform_1, window_bounds = array<i64: 128, 128>}, {pipeline_mode = #tpu.pipeline_mode<synchronous>, transform_indices = @transform_2, window_bounds = array<i64: 16, 128>}]} {
    %c0 = arith.constant 0 : index
    %c0_0 = arith.constant 0 : index
    %0 = vector.load %arg1[%c0, %c0_0] : memref<16x128xf32, #tpu.memory_space<vmem>>, vector<16x128xf32>
    %c0_1 = arith.constant 0 : index
    %c0_2 = arith.constant 0 : index
    %1 = vector.load %arg2[%c0_1, %c0_2] : memref<128x128xf32, #tpu.memory_space<vmem>>, vector<128x128xf32>
    %cst = arith.constant dense<0.000000e+00> : vector<16x128xf32>
    %2 = tpu.matmul %0, %1, %cst {dimension_numbers = #tpu.dot_dimension_numbers<[1], [0], [0], [1], [0, 0, 1, 1], [], []>} : vector<16x128xf32>, vector<128x128xf32>, vector<16x128xf32> -> vector<16x128xf32>
    %c0_3 = arith.constant 0 : index
    %c0_4 = arith.constant 0 : index
    %3 = vector.load %arg3[%c0_3, %c0_4] : memref<16x128xf32, #tpu.memory_space<vmem>>, vector<16x128xf32>
    tpu.vector_store %arg3[%c0_3, %c0_4], %2 {strides = array<i32>} : memref<16x128xf32, #tpu.memory_space<vmem>>, vector<16x128xf32>,
    return
  }
  func.func @transform_0(%arg0: i32) -> (i32, i32) {
    %c0_i32 = arith.constant 0 : i32
    %c0_i32_0 = arith.constant 0 : i32
    %c0_i32_1 = arith.constant 0 : i32
    return %c0_i32, %c0_i32_0 : i32, i32
  }
  func.func @transform_1(%arg0: i32) -> (i32, i32) {
    %c0_i32 = arith.constant 0 : i32
    %c0_i32_0 = arith.constant 0 : i32
    %c0_i32_1 = arith.constant 0 : i32
    return %c0_i32, %c0_i32_0 : i32, i32
  }
  func.func @transform_2(%arg0: i32) -> (i32, i32) {
    %c0_i32 = arith.constant 0 : i32
    %c0_i32_0 = arith.constant 0 : i32
    %c0_i32_1 = arith.constant 0 : i32
    return %c0_i32, %c0_i32_0 : i32, i32
  }
}

</mosaic_0001>

<bundles_post_ra>
// kernel: squeeze.2
= control target key start
LH: loop header
LB: loop body
LE: loop exit
PB: predicated region body
PF: predicated region fallthrough
CT: control target
= control target key end

     0   :  { %s86_s0 = inlined_call_operand.vmem [shape: f32[8,128], index: 0, kind: input, shape index: {}]   ;;  %s87_s1 = inlined_call_operand.hbm [shape: f32[2,2,8,32], index: 1, kind: output, shape index: {}]  }
   0x1   :  { %v6_v0 = vld [vmem:[%s86_s0] sm:$0xff]  }
   0x2   :  { %2 = vsyncpa [#allocation1], 0  ;;  %s66_s0 = smov 96   ;;  %s67_s8 = smov 32   ;;  %vm4_vm0 = vcmask 261120  }
   0x3   :  { %7 = vrot.lane.b32.xlu0 %v6_v0, %s66_s0  ;;  %19 = vrot.lane.b32.xlu1 %v6_v0, %s67_s8  ;;  %s68_s9 = smov 64   ;;  %5 = vst.msk [vmem:[#allocation0] ss:$4 sm:$0xff] %vm4_vm0, %v6_v0   ;;  %s69_s10 = smov [#allocation0]  }
   0x4   :  { %s27_s11 = sshll.u32 %s69_s10, 4  ;;  %s29_s1 = sshll.u32 %s87_s1, 4  ;;  %s28_s11 = int_to_ptr.vmem [resolvable:$true] %s27_s11  ;;  %s30_s1 = int_to_ptr.hbm [resolvable:$true] %s29_s1 }
   0xb   :  { %13 = vrot.lane.b32.xlu0 %v6_v0, %s68_s9 }
  0x75   :  { %v8_v1 = vpop.permute.xlu0 %7   ;;  %v20_v2 = vpop.permute.xlu1 %19  }
  0x76   :  { %11 = vst.msk [vmem:[#allocation0 + $0x1] ss:$4 sm:$0xff] %vm4_vm0, %v8_v1  }
  0x77   :  { %23 = vst.msk [vmem:[#allocation0 + $0x3] ss:$4 sm:$0xff] %vm4_vm0, %v20_v2  }
  0x7d   :  { %v14_v3 = vpop.permute.xlu0 %13  }
  0x7e   :  { %17 = vst.msk [vmem:[#allocation0 + $0x2] ss:$4 sm:$0xff] %vm4_vm0, %v14_v3  }
  0x7f   :  { %32 = dma.vmem_to_hbm [thread:$0]  %s28_s11, 512, %s30_s1, [#allocation1]  }
  0x80   :  { %64 = dma.done.wait [#allocation1], 512  }
  0x81   :  { %65 = vsyncadd [#allocation1], 4294966784 }
  0x82   :  { %35 = vsyncpa [#allocation1], 1 }

// kernel: multi_head_attention_forward.3
= control target key start
LH: loop header
LB: loop body
LE: loop exit
PB: predicated region body
PF: predicated region fallthrough
CT: control target
= control target key end

     0   :  { %v393_v0 = vmov 0   ;;  %vm177_vm0 = vcmask 261120   ;;  %vm248_vm1 = vcmask 257024   ;;  %s646_s5 = inlined_call_operand.vmem [shape: f32[44,1], index: 5, kind: input, shape index: {}]   ;;  %s647_s3 = inlined_call_operand.vmem [shape: f32[44,1], index: 3, kind: input, shape index: {}]   ;;  %s648_s1 = inlined_call_operand.vmem [shape: f32[16,1], index: 1, kind: input, shape index: {}]   ;;  %s649_s7 = inlined_call_operand.vmem [shape: f32[32,32], index: 7, kind: input, shape index: {}]   ;;  %s650_s4 = inlined_call_operand.vmem [shape: f32[44,32], index: 4, kind: input, shape index: {}]   ;;  %s651_s6 = inlined_call_operand.vmem [shape: f32[44,32], index: 6, kind: input, shape index: {}]   ;;  %s652_s2 = inlined_call_operand.vmem [shape: f32[44,32], index: 2, kind: input, shape index: {}]   ;;  %s653_s0 = inlined_call_operand.vmem [shape: f32[16,32], index: 0, kind: input, shape index: {}]   ;;  %s654_s8 = inlined_call_operand.vmem [shape: f32[2,44,32], index: 8, kind: output, shape index: {0}]   ;;  %s655_s9 = inlined_call_operand.vmem [shape: f32[16,32], index: 9, kind: output, shape index: {1}]  }
   0x1   :  { %391 = vset.pattern.permute.xlu1 %v393_v0  ;;  %390 = vset.pattern.permute.xlu0 %v393_v0  ;;  %v139_v1 = vld [vmem:[%s646_s5 + $0x20] sm:$0xff]  ;;  %v94_v3 = vld [vmem:[%s647_s3 + $0x8] sm:$0xff]  ;;  %v95_v9 = vld [vmem:[%s647_s3 + $0x10] sm:$0xff] }
   0x2   :  { %v135_v2 = vld [vmem:[%s646_s5] sm:$0xff]  ;;  %163 = vperm.xlu0 %390, %v139_v1   ;;  %392 = vset.pattern.permute.xlu2 %v393_v0  ;;  %v140_v4 = vld [vmem:[%s646_s5 + $0x28] sm:$0xf]  ;;  %v137_v11 = vld [vmem:[%s646_s5 + $0x10] sm:$0xff] }
   0x3   :  { %143 = vperm.xlu1 %391, %v135_v2   ;;  %106 = vperm.xlu2 %392, %v94_v3   ;;  %v93_v5 = vld [vmem:[%s647_s3] sm:$0xff]  ;;  %v136_v6 = vld [vmem:[%s646_s5 + $0x8] sm:$0xff]  ;;  %v138_v13 = vld [vmem:[%s646_s5 + $0x18] sm:$0xff] }
   0x4   :  { %v97_v7 = vld [vmem:[%s647_s3 + $0x20] sm:$0xff]  ;;  %v38_v10 = vld [vmem:[%s648_s1 + $0x8] sm:$0xff]  ;;  %v96_v14 = vld [vmem:[%s647_s3 + $0x18] sm:$0xff] }
   0x5   :  { %v37_v8 = vld [vmem:[%s648_s1] sm:$0xff]  ;;  %v98_v12 = vld [vmem:[%s647_s3 + $0x28] sm:$0xf]  ;;  %v34_v15 = vld [vmem:[%s649_s7 + $0x18] sm:$0xff] }
   0x6   :  { %359 = vmatpush.xpose.msk.msra.mxu1 %vm177_vm0, %v34_v15  ;;  %385 = vmatpush.xpose.msk.msra.mxu2 %vm177_vm0, %v34_v15  ;;  %v33_v16 = vld [vmem:[%s649_s7 + $0x10] sm:$0xff]  ;;  %v32_v17 = vld [vmem:[%s649_s7 + $0x8] sm:$0xff]  ;;  %v31_v18 = vld [vmem:[%s649_s7] sm:$0xff] }
   0x7   :  { %349 = vmatpush.xpose.msk.msra.mxu0 %vm177_vm0, %v34_v15  ;;  %381 = vmatpush.xpose.msk.msra.mxu3 %vm177_vm0, %v34_v15  ;;  %v61_v19 = vld [vmem:[%s650_s4 + $0x20] sm:$0xff]  ;;  %v58_v26 = vld [vmem:[%s650_s4 + $0x8] sm:$0xff]  ;;  %v53_v55 = vld [vmem:[%s652_s2 + $0x10] sm:$0xff] }
   0x8   :  { %v57_v20 = vld [vmem:[%s650_s4] sm:$0xff]  ;;  %v85_v22 = vmul.f32 5.656854, %v61_v19  ;;  %v62_v29 = vld [vmem:[%s650_s4 + $0x28] sm:$0xf]  ;;  %v59_v59 = vld [vmem:[%s650_s4 + $0x10] sm:$0xff] }
   0x9   :  { %v81_v23 = vmul.f32 5.656854, %v57_v20  ;;  %v67_v24 = vld [vmem:[%s651_s6 + $0x20] sm:$0xff]  ;;  %v82_v31 = vmul.f32 5.656854, %v58_v26  ;;  %v64_v38 = vld [vmem:[%s651_s6 + $0x8] sm:$0xff] }
   0xa   :  { %101 = vperm.xlu0 %390, %v93_v5   ;;  %360 = vmatpush.xpose.msk.msra.mxu1 %vm177_vm0, %v33_v16  ;;  %v63_v25 = vld [vmem:[%s651_s6] sm:$0xff]  ;;  %v91_v27 = vadd.f32 %v85_v22, %v67_v24  ;;  %v86_v36 = vmul.f32 5.656854, %v62_v29  ;;  %v68_v40 = vld [vmem:[%s651_s6 + $0x28] sm:$0xf]  ;;  %v65_v1 = vld [vmem:[%s651_s6 + $0x10] sm:$0xff] }
   0xb   :  { %168 = vperm.xlu1 %391, %v140_v4   ;;  %148 = vperm.xlu2 %392, %v136_v6   ;;  %v87_v28 = vadd.f32 %v81_v23, %v63_v25  ;;  %v51_v30 = vld [vmem:[%s652_s2] sm:$0xff]  ;;  %v52_v41 = vld [vmem:[%s652_s2 + $0x8] sm:$0xff]  ;;  %v88_v42 = vadd.f32 %v82_v31, %v64_v38  ;;  %v71_v60 = vmul.f32 5.656854, %v53_v55  ;;  %v83_v4 = vmul.f32 5.656854, %v59_v59 }
   0xc   :  { %386 = vmatpush.xpose.msk.msra.mxu2 %vm177_vm0, %v33_v16  ;;  %350 = vmatpush.xpose.msk.msra.mxu0 %vm177_vm0, %v33_v16  ;;  %v69_v37 = vmul.f32 5.656854, %v51_v30  ;;  %v92_v43 = vadd.f32 %v86_v36, %v68_v40  ;;  %v55_v45 = vld [vmem:[%s652_s2 + $0x20] sm:$0xff]  ;;  %v70_v46 = vmul.f32 5.656854, %v52_v41  ;;  %v66_v20 = vld [vmem:[%s651_s6 + $0x18] sm:$0xff] }
   0xd   :  { %382 = vmatpush.xpose.msk.msra.mxu3 %vm177_vm0, %v33_v16  ;;  %v73_v52 = vmul.f32 5.656854, %v55_v45  ;;  %v56_v56 = vld [vmem:[%s652_s2 + $0x28] sm:$0xf]  ;;  %v35_v58 = vld [vmem:[%s653_s0] sm:$0xff]  ;;  %v77_v5 = vadd.f32 %v71_v60, %v65_v1 }
   0xe   :  { %361 = vmatpush.xpose.msk.msra.mxu1 %vm177_vm0, %v32_v17  ;;  %v75_v44 = vadd.f32 %v69_v37, %v63_v25  ;;  %v76_v54 = vadd.f32 %v70_v46, %v64_v38  ;;  %v74_v61 = vmul.f32 5.656854, %v56_v56 }
   0xf   :  { %v79_v57 = vadd.f32 %v73_v52, %v67_v24 }
  0x10   :  { %387 = vmatpush.xpose.msk.msra.mxu2 %vm177_vm0, %v32_v17  ;;  %351 = vmatpush.xpose.msk.msra.mxu0 %vm177_vm0, %v32_v17  ;;  %v80_v6 = vadd.f32 %v74_v61, %v68_v40 }
  0x11   :  { %383 = vmatpush.xpose.msk.msra.mxu3 %vm177_vm0, %v32_v17 }
  0x12   :  { %41 = vperm.xlu0 %390, %v37_v8   ;;  %362 = vmatpush.xpose.msk.msra.mxu1 %vm177_vm0, %v31_v18  ;;  %v60_v8 = vld [vmem:[%s650_s4 + $0x18] sm:$0xff] }
  0x13   :  { %121 = vperm.xlu1 %391, %v97_v7   ;;  %111 = vperm.xlu2 %392, %v95_v9   ;;  %v89_v7 = vadd.f32 %v83_v4, %v65_v1 }
  0x14   :  { %388 = vmatpush.xpose.msk.msra.mxu2 %vm177_vm0, %v31_v18  ;;  %352 = vmatpush.xpose.msk.msra.mxu0 %vm177_vm0, %v31_v18 }
  0x15   :  { %384 = vmatpush.xpose.msk.msra.mxu3 %vm177_vm0, %v31_v18 }
  0x18   :  { %375 = vmatpush.xpose.msk.msrb.mxu2 %vm177_vm0, %v34_v15  ;;  %v84_v15 = vmul.f32 5.656854, %v60_v8 }
  0x1a   :  { %153 = vperm.xlu0 %390, %v137_v11   ;;  %v54_v11 = vld [vmem:[%s652_s2 + $0x18] sm:$0xff] }
  0x1b   :  { %46 = vperm.xlu1 %391, %v38_v10   ;;  %126 = vperm.xlu2 %392, %v98_v12   ;;  %v36_v10 = vld [vmem:[%s653_s0 + $0x8] sm:$0xff]  ;;  %v72_v19 = vmul.f32 5.656854, %v54_v11 }
  0x1c   :  { %376 = vmatpush.xpose.msk.msrb.mxu2 %vm177_vm0, %v33_v16 }
  0x1d   :  { %v78_v22 = vadd.f32 %v72_v19, %v66_v20 }
  0x20   :  { %377 = vmatpush.xpose.msk.msrb.mxu2 %vm177_vm0, %v32_v17 }
  0x22   :  { %116 = vperm.xlu0 %390, %v96_v14  }
  0x23   :  { %158 = vperm.xlu1 %391, %v138_v13  }
  0x24   :  { %378 = vmatpush.xpose.msk.msrb.mxu2 %vm177_vm0, %v31_v18 }
  0x5d   :  { %v107_v21 = vpop.permute.xlu2 %106 }
  0x5e   :  { %v130_v0 = vmul.f32 %v107_v21, %v76_v54  ;;  %v90_v21 = vadd.f32 %v84_v15, %v66_v20 }
  0x65   :  { %v149_v39 = vpop.permute.xlu2 %148 }
  0x66   :  { %v172_v49 = vmul.f32 %v149_v39, %v88_v42 }
  0x6d   :  { %v112_v53 = vpop.permute.xlu2 %111 }
  0x6e   :  { %v131_v12 = vmul.f32 %v112_v53, %v77_v5 }
  0x74   :  { %v164_v32 = vpop.permute.xlu0 %163 }
  0x75   :  { %v144_v33 = vpop.permute.xlu1 %143  ;;  %v175_v34 = vmul.f32 %v164_v32, %v91_v27  ;;  %v127_v9 = vpop.permute.xlu2 %126 }
  0x76   :  { %v171_v35 = vmul.f32 %v144_v33, %v87_v28  ;;  %v134_v16 = vmul.f32 %v127_v9, %v80_v6 }
  0x77   :  { %367 = vmatmul.msk.f32.vlgmr.msra.gmra.mxu2 %vm177_vm0, %v175_v34 }
  0x78   :  { %363 = vmatmul.msk.f32.vlgmr.msra.gmra.mxu1 %vm177_vm0, %v171_v35 }
  0x7c   :  { %v102_v48 = vpop.permute.xlu0 %101 }
  0x7d   :  { %v169_v47 = vpop.permute.xlu1 %168  ;;  %v129_v51 = vmul.f32 %v102_v48, %v75_v44 }
  0x7e   :  { %v176_v50 = vmul.f32 %v169_v47, %v92_v43 }
  0x7f   :  { %353 = vmatmul.msk.f32.vlgmr.msra.gmra.mxu0 %vm177_vm0, %v129_v51 }
  0x80   :  { %364 = vmatmul.msk.f32.gmra.mxu1 %vm177_vm0, %v172_v49  ;;  %368 = vmatmul.msk.f32.gmra.mxu2 %vm177_vm0, %v176_v50 }
  0x84   :  { %v42_v63 = vpop.permute.xlu0 %41 }
  0x85   :  { %v122_v62 = vpop.permute.xlu1 %121  ;;  %v49_v3 = vmul.f32 %v42_v63, %v35_v58 }
  0x86   :  { %v133_v2 = vmul.f32 %v122_v62, %v79_v57 }
  0x87   :  { %354 = vmatmul.msk.f32.gmra.mxu0 %vm177_vm0, %v130_v0 }
  0x88   :  { %357 = vmatmul.msk.f32.vlgmr.msra.gmra.mxu3 %vm177_vm0, %v133_v2  ;;  %379 = vmatmul.msk.f32.vlgmr.msrb.gmra.mxu2 %vm177_vm0, %v49_v3 }
  0x8c   :  { %v154_v14 = vpop.permute.xlu0 %153 }
  0x8d   :  { %v47_v13 = vpop.permute.xlu1 %46  ;;  %v173_v18 = vmul.f32 %v154_v14, %v89_v7 }
  0x8e   :  { %v50_v17 = vmul.f32 %v47_v13, %v36_v10 }
  0x8f   :  { %355 = vmatmul.msk.f32.gmra.mxu0 %vm177_vm0, %v131_v12  ;;  %365 = vmatmul.msk.f32.gmra.mxu1 %vm177_vm0, %v173_v18 }
  0x90   :  { %358 = vmatmul.msk.f32.gmra.mxu3 %vm177_vm0, %v134_v16  ;;  %380 = vmatmul.msk.f32.gmra.mxu2 %vm177_vm0, %v50_v17 }
  0x94   :  { %v117_v24 = vpop.permute.xlu0 %116 }
  0x95   :  { %v159_v23 = vpop.permute.xlu1 %158  ;;  %v132_v26 = vmul.f32 %v117_v24, %v78_v22 }
  0x96   :  { %v174_v25 = vmul.f32 %v159_v23, %v90_v21 }
  0x97   :  { %356 = vmatmul.msk.f32.gmra.mxu0 %vm177_vm0, %v132_v26 }
  0x98   :  { %366 = vmatmul.msk.f32.gmra.mxu1 %vm177_vm0, %v174_v25 }
  0xf5   :  { %v285_v27 = vpop.f32.mrf.mxu1 }
  0xf6   :  { %369 = vst.msk [vmem:[%s654_s8 + $0x30] sm:$0xff] %vm177_vm0, %v285_v27 }
  0xfa   :  { %v297_v28 = vpop.f32.mrf.mxu2 }
  0xfb   :  { %373 = vst.msk [vmem:[%s654_s8 + $0x50] sm:$0xff] %vm177_vm0, %v297_v28 }
  0xfc   :  { %v225_v29 = vpop.f32.mrf.mxu0 }
  0xfd   :  { %v288_v30 = vpop.f32.mrf.mxu1  ;;  %243 = vst.msk [vmem:[%s654_s8] sm:$0xff] %vm177_vm0, %v225_v29 }
  0xfe   :  { %370 = vst.msk [vmem:[%s654_s8 + $0x38] sm:$0xff] %vm177_vm0, %v288_v30 }
 0x103   :  { %v300_v31 = vpop.f32.mrf.mxu2 }
 0x104   :  { %374 = vst.msk [vmem:[%s654_s8 + $0x58] sm:$0xf] %vm248_vm1, %v300_v31  ;;  %v228_v32 = vpop.f32.mrf.mxu0 }
 0x105   :  { %244 = vst.msk [vmem:[%s654_s8 + $0x8] sm:$0xff] %vm177_vm0, %v228_v32 }
 0x10b   :  { %v237_v33 = vpop.f32.mrf.mxu3  ;;  %v333_v34 = vpop.f32.mrf.mxu2 }
 0x10c   :  { %247 = vst.msk [vmem:[%s654_s8 + $0x20] sm:$0xff] %vm177_vm0, %v237_v33  ;;  %v231_v35 = vpop.f32.mrf.mxu0  ;;  %v291_v36 = vpop.f32.mrf.mxu1 }
 0x10d   :  { %339 = vst.msk [vmem:[%s655_s9] sm:$0xff] %vm177_vm0, %v333_v34 }
 0x10e   :  { %245 = vst.msk [vmem:[%s654_s8 + $0x10] sm:$0xff] %vm177_vm0, %v231_v35 }
 0x10f   :  { %371 = vst.msk [vmem:[%s654_s8 + $0x40] sm:$0xff] %vm177_vm0, %v291_v36 }
 0x113   :  { %v240_v37 = vpop.f32.mrf.mxu3  ;;  %v336_v38 = vpop.f32.mrf.mxu2 }
 0x114   :  { %249 = vst.msk [vmem:[%s654_s8 + $0x28] sm:$0xf] %vm248_vm1, %v240_v37  ;;  %v234_v39 = vpop.f32.mrf.mxu0 }
 0x115   :  { %340 = vst.msk [vmem:[%s655_s9 + $0x8] sm:$0xff] %vm177_vm0, %v336_v38  ;;  %v294_v40 = vpop.f32.mrf.mxu1 }
 0x116   :  { %246 = vst.msk [vmem:[%s654_s8 + $0x18] sm:$0xff] %vm177_vm0, %v234_v39 }
 0x117   :  { %372 = vst.msk [vmem:[%s654_s8 + $0x48] sm:$0xff] %vm177_vm0, %v294_v40 }

// kernel: multi_head_attention_forward.4
= control target key start
LH: loop header
LB: loop body
LE: loop exit
PB: predicated region body
PF: predicated region fallthrough
CT: control target
= control target key end

     0   :  { %s1470_s9 = smov 0   ;;  %s1931_s0 = inlined_call_operand.vmem [shape: f32[2,4,8,8], index: 0, kind: input, shape index: {}]   ;;  %s1932_s1 = inlined_call_operand.vmem [shape: f32[2,16,11,8], index: 1, kind: input, shape index: {}]   ;;  %s1933_s2 = inlined_call_operand.vmem [shape: f32[2,16,8,8], index: 2, kind: output, shape index: {}]  }
   0x1 LB: > { %s1282_s10 = sadd.s32 4294967295, %s1453_s9   ;;  %p1286_p0 = scmp.ge.s32.totalorder %s1453_s9, 1  ;;  %s1453_s9 = sphi %s1470_s9, %s12_s9  }
   0x2   : > { %p112_p1 = scmp.lt.s32.totalorder %s1453_s9, 3 }
   0x4   : > { %p113_p2 = pnand %p1286_p0, %p112_p1 }
   0x5   : > { %p134_p3 = scmp.lt.s32.totalorder (!%p113_p2), %s1282_s10, 1 }
   0x6   : > { %116 = sbr.rel (%p113_p2) target bundleno = 584 (0x248), region = 28 }
   0xb   : > { %s1935_s10 = smov (!%p134_p3, %s1282_s10), 1  ;;  %vm192_vm0 = vcmask 64512   ;;  %v144_v0 = vld [vmem:[%s1931_s0] sm:$0xff]  ;;  %v146_v4 = vld [vmem:[%s1931_s0 + $0x10] sm:$0xff]  ;;  %v147_v5 = vld [vmem:[%s1931_s0 + $0x18] sm:$0xff]  ;;  %vm633_vm1 = vcmask 89088  }
   0xc   : > { %s1373_s11 = sshll.u32 %s1935_s10, 8  ;;  %v152_v10 = vmul.f32 0.35355338, %v144_v0  ;;  %v145_v12 = vld [vmem:[%s1931_s0 + $0x8] sm:$0xff]  ;;  %v154_v13 = vmul.f32 0.35355338, %v146_v4 }
   0xd   : > { %s1484_s14 = scalar_lea.vmem %s1932_s1, %s1373_s11  ;;  %v155_v16 = vmul.f32 0.35355338, %v147_v5  ;;  %v153_v17 = vmul.f32 0.35355338, %v145_v12  ;;  %v150_v31 = vld [vmem:[%s1931_s0 + $0x30] sm:$0xff]  ;;  %v151_v34 = vld [vmem:[%s1931_s0 + $0x38] sm:$0xff] }
   0xe   : > { %v1490_v1 = vld [vmem:[%s1484_s14 + $0x8] sm:$0x7]  ;;  %v1496_v3 = vld [vmem:[%s1484_s14 + $0x38] sm:$0x7]  ;;  %v1511_v6 = vld [vmem:[%s1484_s14] sm:$0xff]  ;;  %vm813_vm2 = vcmask 1042432  }
   0xf   : > { %v1493_v2 = vld [vmem:[%s1484_s14 + $0x28] sm:$0x7]  ;;  %1291 = vmatpush.xpose.msk.msra.mxu0 %vm192_vm0, %v1490_v1  ;;  %1300 = vmatpush.xpose.msk.msra.mxu3 %vm192_vm0, %v1496_v3  ;;  %v1514_v7 = vld [vmem:[%s1484_s14 + $0x20] sm:$0xff]  ;;  %v1517_v8 = vld [vmem:[%s1484_s14 + $0x18] sm:$0x7]  ;;  %s1374_s3 = sshll.u32 %s1935_s10, 7 }
  0x10   : > { %1297 = vmatpush.xpose.msk.msra.mxu2 %vm192_vm0, %v1493_v2  ;;  %v1520_v9 = vld [vmem:[%s1484_s14 + $0x30] sm:$0xff]  ;;  %1294 = vmatpush.xpose.msk.msra.mxu1 %vm192_vm0, %v1517_v8  ;;  %v1525_v11 = vld [vmem:[%s1484_s14 + $0x68] sm:$0x7]  ;;  %v1531_v14 = vld [vmem:[%s1484_s14 + $0x78] sm:$0x7]  ;;  %s1894_s6 = scalar_lea.vmem %s1933_s2, %s1374_s3 }
  0x11   : > { %v1534_v15 = vld [vmem:[%s1484_s14 + $0x10] sm:$0xff]  ;;  %v1545_v18 = vld [vmem:[%s1484_s14 + $0x48] sm:$0x7]  ;;  %v1552_v19 = vld [vmem:[%s1484_s14 + $0x60] sm:$0xff]  ;;  %v158_v38 = vmul.f32 0.35355338, %v150_v31 }
  0x12   : > { %v1557_v20 = vld [vmem:[%s1484_s14 + $0x70] sm:$0xff]  ;;  %v1560_v21 = vld [vmem:[%s1484_s14 + $0x58] sm:$0x7]  ;;  %v1569_v23 = vld [vmem:[%s1484_s14 + $0xa8] sm:$0x7] }
  0x13   : > { %1292 = vmatpush.xpose.msk.msra.mxu0 %vm192_vm0, %v1511_v6  ;;  %1301 = vmatpush.xpose.msk.msra.mxu3 %vm192_vm0, %v1520_v9  ;;  %v1566_v22 = vld [vmem:[%s1484_s14 + $0xb8] sm:$0x7]  ;;  %v1575_v24 = vld [vmem:[%s1484_s14 + $0x40] sm:$0xff]  ;;  %v1582_v25 = vld [vmem:[%s1484_s14 + $0x88] sm:$0x7] }
  0x14   : > { %1298 = vmatpush.xpose.msk.msra.mxu2 %vm192_vm0, %v1514_v7  ;;  %1295 = vmatpush.xpose.msk.msra.mxu1 %vm192_vm0, %v1534_v15  ;;  %v1587_v26 = vld [vmem:[%s1484_s14 + $0x50] sm:$0xff]  ;;  %v1601_v28 = vld [vmem:[%s1484_s14 + $0xf8] sm:$0x7]  ;;  %v1607_v29 = vld [vmem:[%s1484_s14 + $0x80] sm:$0xff]  ;;  %v159_v40 = vmul.f32 0.35355338, %v151_v34 }
  0x15   : > { %v1594_v27 = vld [vmem:[%s1484_s14 + $0xb0] sm:$0xff]  ;;  %v1610_v30 = vld [vmem:[%s1484_s14 + $0xa0] sm:$0xff]  ;;  %v1618_v32 = vld [vmem:[%s1484_s14 + $0xe8] sm:$0x7] }
  0x16   : > { %1293 = vmatmul.msk.f32.vlgmr.msra.gmra.mxu0 %vm192_vm0, %v152_v10  ;;  %1302 = vmatmul.msk.f32.vlgmr.msra.gmra.mxu3 %vm192_vm0, %v155_v16  ;;  %v1621_v33 = vld [vmem:[%s1484_s14 + $0x98] sm:$0x7]  ;;  %v148_v35 = vld [vmem:[%s1931_s0 + $0x20] sm:$0xff]  ;;  %v1633_v36 = vld [vmem:[%s1484_s14 + $0xc8] sm:$0x7] }
  0x17   : > { %1312 = vmatpush.xpose.msk.msrb.mxu3 %vm192_vm0, %v1531_v14  ;;  %1299 = vmatmul.msk.f32.vlgmr.msra.gmra.mxu2 %vm192_vm0, %v154_v13  ;;  %v1640_v37 = vld [vmem:[%s1484_s14 + $0xf0] sm:$0xff]  ;;  %v149_v39 = vld [vmem:[%s1931_s0 + $0x28] sm:$0xff]  ;;  %v156_v41 = vmul.f32 0.35355338, %v148_v35  ;;  %v1657_v43 = vld [vmem:[%s1484_s14 + $0xe0] sm:$0xff] }
  0x18   : > { %1309 = vmatpush.xpose.msk.msrb.mxu2 %vm192_vm0, %v1525_v11  ;;  %1303 = vmatpush.xpose.msk.msrb.mxu0 %vm192_vm0, %v1545_v18  ;;  %v1650_v42 = vld [vmem:[%s1484_s14 + $0x90] sm:$0xff]  ;;  %v157_v44 = vmul.f32 0.35355338, %v149_v39  ;;  %v1660_v45 = vld [vmem:[%s1484_s14 + $0xd8] sm:$0x7]  ;;  %v1666_v46 = vld [vmem:[%s1484_s14 + $0xc0] sm:$0xff] }
  0x19   : > { %1296 = vmatmul.msk.f32.vlgmr.msra.gmra.mxu1 %vm192_vm0, %v153_v17  ;;  %v1678_v47 = vld [vmem:[%s1484_s14 + $0xd0] sm:$0xff] }
  0x1a   : > { %1306 = vmatpush.xpose.msk.msrb.mxu1 %vm192_vm0, %v1560_v21 }
  0x1b   : > { %1313 = vmatpush.xpose.msk.msrb.mxu3 %vm192_vm0, %v1557_v20 }
  0x1c   : > { %1310 = vmatpush.xpose.msk.msrb.mxu2 %vm192_vm0, %v1552_v19  ;;  %1304 = vmatpush.xpose.msk.msrb.mxu0 %vm192_vm0, %v1575_v24 }
  0x1e   : > { %1307 = vmatpush.xpose.msk.msrb.mxu1 %vm192_vm0, %v1587_v26  ;;  %1314 = vmatmul.msk.f32.vlgmr.msrb.gmra.mxu3 %vm192_vm0, %v155_v16 }
  0x1f   : > { %1324 = vmatpush.xpose.msk.msra.mxu3 %vm192_vm0, %v1566_v22  ;;  %1311 = vmatmul.msk.f32.vlgmr.msrb.gmra.mxu2 %vm192_vm0, %v154_v13 }
  0x20   : > { %1321 = vmatpush.xpose.msk.msra.mxu2 %vm192_vm0, %v1569_v23  ;;  %1315 = vmatpush.xpose.msk.msra.mxu0 %vm192_vm0, %v1582_v25 }
  0x21   : > { %1305 = vmatmul.msk.f32.vlgmr.msrb.gmra.mxu0 %vm192_vm0, %v152_v10  ;;  %1308 = vmatmul.msk.f32.vlgmr.msrb.gmra.mxu1 %vm192_vm0, %v153_v17 }
  0x22   : > { %1318 = vmatpush.xpose.msk.msra.mxu1 %vm192_vm0, %v1621_v33 }
  0x23   : > { %1325 = vmatpush.xpose.msk.msra.mxu3 %vm192_vm0, %v1594_v27 }
  0x24   : > { %1316 = vmatpush.xpose.msk.msra.mxu0 %vm192_vm0, %v1607_v29  ;;  %1322 = vmatpush.xpose.msk.msra.mxu2 %vm192_vm0, %v1610_v30 }
  0x26   : > { %1319 = vmatpush.xpose.msk.msra.mxu1 %vm192_vm0, %v1650_v42  ;;  %1326 = vmatmul.msk.f32.vlgmr.msra.gmra.mxu3 %vm192_vm0, %v159_v40 }
  0x27   : > { %1336 = vmatpush.xpose.msk.msrb.mxu3 %vm192_vm0, %v1601_v28  ;;  %1323 = vmatmul.msk.f32.vlgmr.msra.gmra.mxu2 %vm192_vm0, %v158_v38 }
  0x28   : > { %1333 = vmatpush.xpose.msk.msrb.mxu2 %vm192_vm0, %v1618_v32  ;;  %1327 = vmatpush.xpose.msk.msrb.mxu0 %vm192_vm0, %v1633_v36 }
  0x29   : > { %1317 = vmatmul.msk.f32.vlgmr.msra.gmra.mxu0 %vm192_vm0, %v156_v41  ;;  %1320 = vmatmul.msk.f32.vlgmr.msra.gmra.mxu1 %vm192_vm0, %v157_v44 }
  0x2a   : > { %1330 = vmatpush.xpose.msk.msrb.mxu1 %vm192_vm0, %v1660_v45 }
  0x2b   : > { %1337 = vmatpush.xpose.msk.msrb.mxu3 %vm192_vm0, %v1640_v37 }
  0x2c   : > { %1334 = vmatpush.xpose.msk.msrb.mxu2 %vm192_vm0, %v1657_v43  ;;  %1328 = vmatpush.xpose.msk.msrb.mxu0 %vm192_vm0, %v1666_v46 }
  0x2e   : > { %1331 = vmatpush.xpose.msk.msrb.mxu1 %vm192_vm0, %v1678_v47  ;;  %1338 = vmatmul.msk.f32.vlgmr.msrb.gmra.mxu3 %vm192_vm0, %v159_v40 }
  0x2f   : > { %1335 = vmatmul.msk.f32.vlgmr.msrb.gmra.mxu2 %vm192_vm0, %v158_v38  ;;  %1345 = vmatpush.msk.msra.mxu3 %vm813_vm2, %v1496_v3 }
  0x30   : > { %1339 = vmatpush.msk.msra.mxu0 %vm813_vm2, %v1490_v1  ;;  %1343 = vmatpush.msk.msra.mxu2 %vm813_vm2, %v1493_v2 }
  0x31   : > { %1329 = vmatmul.msk.f32.vlgmr.msrb.gmra.mxu0 %vm192_vm0, %v156_v41  ;;  %1332 = vmatmul.msk.f32.vlgmr.msrb.gmra.mxu1 %vm192_vm0, %v157_v44 }
  0x32   : > { %1341 = vmatpush.msk.msra.mxu1 %vm813_vm2, %v1517_v8  ;;  %831 = vmatpush.msra.mxu0 %v1511_v6 }
  0x33   : > { %906 = vmatpush.msra.mxu3 %v1520_v9  ;;  %881 = vmatpush.msra.mxu2 %v1514_v7 }
  0x34   : > { %856 = vmatpush.msra.mxu1 %v1534_v15  ;;  %1347 = vmatpush.msk.msrb.mxu0 %vm813_vm2, %v1545_v18 }
  0x35   : > { %1353 = vmatpush.msk.msrb.mxu3 %vm813_vm2, %v1531_v14  ;;  %1351 = vmatpush.msk.msrb.mxu2 %vm813_vm2, %v1525_v11 }
  0x36   : > { %1349 = vmatpush.msk.msrb.mxu1 %vm813_vm2, %v1560_v21  ;;  %931 = vmatpush.msrb.mxu0 %v1575_v24 }
  0x37   : > { %1006 = vmatpush.msrb.mxu3 %v1557_v20  ;;  %981 = vmatpush.msrb.mxu2 %v1552_v19 }
  0x38   : > { %956 = vmatpush.msrb.mxu1 %v1587_v26 }
  0x93   : > { %v219_v48 = vpop.f32.mrf.mxu0 }
  0x94   : > { %v634_v49 = vsel %vm633_vm1, %v219_v48, -inf }
  0x95   : > { %635 = vmax.xlane.f32.xlu1 %v634_v49 }
  0x96   : > { %v248_v50 = vpop.f32.mrf.mxu1 }
  0x97   : > { %v637_v54 = vsel %vm633_vm1, %v248_v50, -inf }
  0x99   : > { %v306_v52 = vpop.f32.mrf.mxu3 }
  0x9a   : > { %v277_v51 = vpop.f32.mrf.mxu2  ;;  %v643_v57 = vsel %vm633_vm1, %v306_v52, -inf }
  0x9b   : > { %v640_v53 = vsel %vm633_vm1, %v277_v51, -inf }
  0x9c   : > { %641 = vmax.xlane.f32.xlu0 %v640_v53 }
  0x9d   : > { %638 = vmax.xlane.f32.xlu1 %v637_v54 }
  0x9e   : > { %v1689_v55 = vpop.f32.mrf.mxu0  ;;  %v358_v56 = vpop.f32.mrf.mxu1 }
  0x9f   : > { %v649_v61 = vsel %vm633_vm1, %v358_v56, -inf  ;;  %v646_v0 = vsel %vm633_vm1, %v1689_v55, -inf }
  0xa1   : > { %v1694_v59 = vpop.f32.mrf.mxu3 }
  0xa2   : > { %v1692_v58 = vpop.f32.mrf.mxu2  ;;  %v655_v63 = vsel %vm633_vm1, %v1694_v59, -inf }
  0xa3   : > { %v652_v60 = vsel %vm633_vm1, %v1692_v58, -inf }
  0xa4   : > { %644 = vmax.xlane.f32.xlu0 %v643_v57  ;;  %653 = vmax.xlane.f32.xlu2 %v652_v60 }
  0xa5   : > { %650 = vmax.xlane.f32.xlu1 %v649_v61 }
  0xa6   : > { %v1699_v62 = vpop.f32.mrf.mxu0  ;;  %v1719_v31 = vpop.f32.mrf.mxu1 }
  0xa7   : > { %v658_v5 = vsel %vm633_vm1, %v1699_v62, -inf  ;;  %v661_v35 = vsel %vm633_vm1, %v1719_v31, -inf }
  0xa9   : > { %v1705_v4 = vpop.f32.mrf.mxu3 }
  0xaa   : > { %v1709_v10 = vpop.f32.mrf.mxu2  ;;  %v667_v13 = vsel %vm633_vm1, %v1705_v4, -inf }
  0xab   : > { %v664_v12 = vsel %vm633_vm1, %v1709_v10, -inf }
  0xac   : > { %656 = vmax.xlane.f32.xlu2 %v655_v63  ;;  %647 = vmax.xlane.f32.xlu0 %v646_v0 }
  0xad   : > { %659 = vmax.xlane.f32.xlu1 %v658_v5 }
  0xae   : > { %v1727_v39 = vpop.f32.mrf.mxu0  ;;  %v1729_v40 = vpop.f32.mrf.mxu1 }
  0xaf   : > { %v673_v41 = vsel %vm633_vm1, %v1729_v40, -inf  ;;  %v670_v44 = vsel %vm633_vm1, %v1727_v39, -inf }
  0xb1   : > { %v1715_v16 = vpop.f32.mrf.mxu3 }
  0xb2   : > { %v679_v17 = vsel %vm633_vm1, %v1715_v16, -inf  ;;  %v1721_v34 = vpop.f32.mrf.mxu2 }
  0xb3   : > { %v676_v38 = vsel %vm633_vm1, %v1721_v34, -inf }
  0xb4   : > { %665 = vmax.xlane.f32.xlu2 %v664_v12  ;;  %668 = vmax.xlane.f32.xlu0 %v667_v13 }
  0xb5   : > { %680 = vmax.xlane.f32.xlu1 %v679_v17 }
  0xbc   : > { %662 = vmax.xlane.f32.xlu2 %v661_v35  ;;  %677 = vmax.xlane.f32.xlu0 %v676_v38 }
  0xc4   : > { %674 = vmax.xlane.f32.xlu0 %v673_v41  ;;  %671 = vmax.xlane.f32.xlu2 %v670_v44 }
 0x108   : > { %v636_v49 = vpop.xlane.xlu1 %635 }
 0x109   : > { %v682_v53 = vsub.f32 %v219_v48, %v636_v49 }
 0x10b   : > { %v698_v54 = vmul.f32 1.442695, %v682_v53 }
 0x10d   : > { %1383 = vpow2.f32 %v698_v54 }
 0x10f   : > { %v642_v57 = vpop.xlane.xlu0 %641 }
 0x110   : > { %v639_v60 = vpop.xlane.xlu1 %638  ;;  %v684_v63 = vsub.f32 %v277_v51, %v642_v57 }
 0x111   : > { %v683_v61 = vsub.f32 %v248_v50, %v639_v60 }
 0x112   : > { %v702_v13 = vmul.f32 1.442695, %v684_v63 }
 0x113   : > { %v1735_v0 = vpop.eup %1383  ;;  %v700_v5 = vmul.f32 1.442695, %v683_v61 }
 0x114   : > { %v730_v12 = vsel %vm633_vm1, %v1735_v0, 0.0 }
 0x115   : > { %1385 = vpow2.f32 %v700_v5  ;;  %731 = vadd.xlane.f32.xlu0 %v730_v12 }
 0x116   : > { %1387 = vpow2.f32 %v702_v13 }
 0x117   : > { %v645_v17 = vpop.xlane.xlu0 %644  ;;  %v654_v35 = vpop.xlane.xlu2 %653 }
 0x118   : > { %v685_v38 = vsub.f32 %v306_v52, %v645_v17  ;;  %v651_v41 = vpop.xlane.xlu1 %650 }
 0x119   : > { %v687_v44 = vsub.f32 %v358_v56, %v651_v41  ;;  %v688_v56 = vsub.f32 %v1692_v58, %v654_v35 }
 0x11a   : > { %v704_v48 = vmul.f32 1.442695, %v685_v38 }
 0x11b   : > { %v1739_v49 = vpop.eup %1385  ;;  %v708_v51 = vmul.f32 1.442695, %v687_v44 }
 0x11c   : > { %1389 = vpow2.f32 %v704_v48  ;;  %v733_v50 = vsel %vm633_vm1, %v1739_v49, 0.0  ;;  %v1745_v61 = vpop.eup %1387 }
 0x11d   : > { %734 = vadd.xlane.f32.xlu1 %v733_v50  ;;  %1391 = vpow2.f32 %v708_v51 }
 0x11f   : > { %v657_v53 = vpop.xlane.xlu2 %656  ;;  %v648_v54 = vpop.xlane.xlu0 %647 }
 0x120   : > { %v689_v57 = vsub.f32 %v1694_v59, %v657_v53  ;;  %v686_v60 = vsub.f32 %v1689_v55, %v648_v54  ;;  %v660_v13 = vpop.xlane.xlu1 %659  ;;  %v736_v59 = vsel %vm633_vm1, %v1745_v61, 0.0  ;;  %v710_v55 = vmul.f32 1.442695, %v688_v56 }
 0x121   : > { %v690_v44 = vsub.f32 %v1699_v62, %v660_v13 }
 0x122   : > { %v1747_v52 = vpop.eup %1389  ;;  %v712_v63 = vmul.f32 1.442695, %v689_v57  ;;  %v706_v5 = vmul.f32 1.442695, %v686_v60 }
 0x123   : > { %v739_v12 = vsel %vm633_vm1, %v1747_v52, 0.0  ;;  %v1754_v41 = vpop.eup %1391 }
 0x124   : > { %1393 = vpow2.f32 %v712_v63  ;;  %740 = vadd.xlane.f32.xlu2 %v739_v12  ;;  %v745_v57 = vsel %vm633_vm1, %v1754_v41, 0.0 }
 0x125   : > { %1395 = vpow2.f32 %v706_v5  ;;  %737 = vadd.xlane.f32.xlu1 %v736_v59 }
 0x126   : > { %1397 = vpow2.f32 %v710_v55 }
 0x127   : > { %v666_v17 = vpop.xlane.xlu2 %665  ;;  %v669_v38 = vpop.xlane.xlu0 %668 }
 0x128   : > { %v692_v58 = vsub.f32 %v1709_v10, %v666_v17  ;;  %v693_v35 = vsub.f32 %v1705_v4, %v669_v38  ;;  %v714_v10 = vmul.f32 1.442695, %v690_v44  ;;  %v681_v60 = vpop.xlane.xlu1 %680 }
 0x129   : > { %v697_v59 = vsub.f32 %v1715_v16, %v681_v60 }
 0x12a   : > { %v1758_v48 = vpop.eup %1393  ;;  %v718_v50 = vmul.f32 1.442695, %v692_v58  ;;  %v720_v51 = vmul.f32 1.442695, %v693_v35 }
 0x12b   : > { %v1761_v53 = vpop.eup %1395  ;;  %v751_v54 = vsel %vm633_vm1, %v1758_v48, 0.0 }
 0x12c   : > { %1399 = vpow2.f32 %v718_v50  ;;  %752 = vadd.xlane.f32.xlu0 %v751_v54  ;;  %746 = vadd.xlane.f32.xlu2 %v745_v57  ;;  %v742_v4 = vsel %vm633_vm1, %v1761_v53, 0.0  ;;  %v1769_v63 = vpop.eup %1397 }
 0x12d   : > { %1401 = vpow2.f32 %v720_v51  ;;  %743 = vadd.xlane.f32.xlu1 %v742_v4  ;;  %v748_v35 = vsel %vm633_vm1, %v1769_v63, 0.0 }
 0x12e   : > { %1403 = vpow2.f32 %v714_v10 }
 0x12f   : > { %v663_v62 = vpop.xlane.xlu2 %662  ;;  %v678_v56 = vpop.xlane.xlu0 %677 }
 0x130   : > { %v691_v5 = vsub.f32 %v1719_v31, %v663_v62  ;;  %v696_v12 = vsub.f32 %v1721_v34, %v678_v56  ;;  %v728_v34 = vmul.f32 1.442695, %v697_v59 }
 0x132   : > { %v1773_v13 = vpop.eup %1399  ;;  %v716_v55 = vmul.f32 1.442695, %v691_v5  ;;  %v726_v17 = vmul.f32 1.442695, %v696_v12 }
 0x133   : > { %v1776_v38 = vpop.eup %1401  ;;  %v760_v58 = vsel %vm633_vm1, %v1773_v13, 0.0 }
 0x134   : > { %1405 = vpow2.f32 %v716_v55  ;;  %761 = vadd.xlane.f32.xlu0 %v760_v58  ;;  %749 = vadd.xlane.f32.xlu2 %v748_v35  ;;  %v763_v31 = vsel %vm633_vm1, %v1776_v38, 0.0  ;;  %v1784_v50 = vpop.eup %1403 }
 0x135   : > { %1407 = vpow2.f32 %v726_v17  ;;  %764 = vadd.xlane.f32.xlu1 %v763_v31  ;;  %v754_v56 = vsel %vm633_vm1, %v1784_v50, 0.0 }
 0x136   : > { %1409 = vpow2.f32 %v728_v34 }
 0x137   : > { %v675_v16 = vpop.xlane.xlu0 %674  ;;  %v672_v44 = vpop.xlane.xlu2 %671 }
 0x138   : > { %v695_v51 = vsub.f32 %v1729_v40, %v675_v16  ;;  %v694_v54 = vsub.f32 %v1727_v39, %v672_v44 }
 0x13a   : > { %v1788_v57 = vpop.eup %1405  ;;  %v724_v4 = vmul.f32 1.442695, %v695_v51  ;;  %v722_v10 = vmul.f32 1.442695, %v694_v54 }
 0x13b   : > { %v1790_v60 = vpop.eup %1407  ;;  %v757_v62 = vsel %vm633_vm1, %v1788_v57, 0.0 }
 0x13c   : > { %1411 = vpow2.f32 %v724_v4  ;;  %758 = vadd.xlane.f32.xlu0 %v757_v62  ;;  %755 = vadd.xlane.f32.xlu2 %v754_v56  ;;  %v772_v39 = vsel %vm633_vm1, %v1790_v60, 0.0  ;;  %v1798_v40 = vpop.eup %1409 }
 0x13d   : > { %1413 = vpow2.f32 %v722_v10  ;;  %773 = vadd.xlane.f32.xlu1 %v772_v39  ;;  %v775_v59 = vsel %vm633_vm1, %v1798_v40, 0.0 }
 0x142   : > { %v1800_v5 = vpop.eup %1411 }
 0x143   : > { %v1802_v12 = vpop.eup %1413  ;;  %v769_v17 = vsel %vm633_vm1, %v1800_v5, 0.0 }
 0x144   : > { %776 = vadd.xlane.f32.xlu2 %v775_v59  ;;  %v766_v55 = vsel %vm633_vm1, %v1802_v12, 0.0 }
 0x145   : > { %767 = vadd.xlane.f32.xlu0 %v766_v55  ;;  %770 = vadd.xlane.f32.xlu1 %v769_v17 }
 0x188   : > { %v732_v1 = vpop.xlane.xlu0 %731 }
 0x189   : > { %1415 = vrcp.f32 %v732_v1 }
 0x18f   : > { %v1416_v2 = vpop.eup %1415 }
 0x190   : > { %v794_v3 = vmul.f32 %v1416_v2, %v1735_v0  ;;  %v735_v6 = vpop.xlane.xlu1 %734 }
 0x191   : > { %1417 = vrcp.f32 %v735_v6 }
 0x192   : > { %1340 = vmatmul.msk.f32.vlgmr.msra.gmra.mxu0 %vm633_vm1, %v794_v3 }
 0x193   : > { %1355 = vmatpush.msk.msra.mxu0 %vm813_vm2, %v1582_v25 }
 0x195   : > { %1031 = vmatpush.msra.mxu0 %v1607_v29 }
 0x197   : > { %v741_v7 = vpop.xlane.xlu2 %740  ;;  %v1418_v8 = vpop.eup %1417 }
 0x198   : > { %1419 = vrcp.f32 %v741_v7  ;;  %v795_v9 = vmul.f32 %v1418_v8, %v1739_v49  ;;  %v738_v11 = vpop.xlane.xlu1 %737 }
 0x199   : > { %1421 = vrcp.f32 %v738_v11 }
 0x19a   : > { %1342 = vmatmul.msk.f32.vlgmr.msra.gmra.mxu1 %vm633_vm1, %v795_v9 }
 0x19b   : > { %1357 = vmatpush.msk.msra.mxu1 %vm813_vm2, %v1621_v33 }
 0x19d   : > { %1056 = vmatpush.msra.mxu1 %v1650_v42 }
 0x19e   : > { %v1420_v14 = vpop.eup %1419 }
 0x19f   : > { %v797_v15 = vmul.f32 %v1420_v14, %v1747_v52  ;;  %v753_v18 = vpop.xlane.xlu0 %752  ;;  %v747_v19 = vpop.xlane.xlu2 %746 }
 0x1a0   : > { %v1422_v20 = vpop.eup %1421  ;;  %1423 = vrcp.f32 %v753_v18  ;;  %v744_v24 = vpop.xlane.xlu1 %743 }
 0x1a1   : > { %v796_v21 = vmul.f32 %v1422_v20, %v1745_v61  ;;  %1425 = vrcp.f32 %v747_v19  ;;  %1346 = vmatmul.msk.f32.vlgmr.msra.gmra.mxu3 %vm633_vm1, %v797_v15 }
 0x1a2   : > { %1427 = vrcp.f32 %v744_v24  ;;  %1361 = vmatpush.msk.msra.mxu3 %vm813_vm2, %v1566_v22 }
 0x1a3   : > { %1344 = vmatmul.msk.f32.vlgmr.msra.gmra.mxu2 %vm633_vm1, %v796_v21 }
 0x1a4   : > { %1359 = vmatpush.msk.msra.mxu2 %vm813_vm2, %v1569_v23  ;;  %1106 = vmatpush.msra.mxu3 %v1594_v27 }
 0x1a6   : > { %v1424_v25 = vpop.eup %1423  ;;  %1081 = vmatpush.msra.mxu2 %v1610_v30 }
 0x1a7   : > { %v1426_v26 = vpop.eup %1425  ;;  %v801_v29 = vmul.f32 %v1424_v25, %v1758_v48  ;;  %v762_v33 = vpop.xlane.xlu0 %761 }
 0x1a8   : > { %v750_v42 = vpop.xlane.xlu2 %749  ;;  %v1428_v0 = vpop.eup %1427  ;;  %v799_v49 = vmul.f32 %v1426_v26, %v1754_v41 }
 0x1a9   : > { %v798_v22 = vmul.f32 %v1428_v0, %v1761_v53  ;;  %1429 = vrcp.f32 %v750_v42  ;;  %v765_v61 = vpop.xlane.xlu1 %764  ;;  %1354 = vmatmul.msk.f32.vlgmr.msrb.gmra.mxu3 %vm633_vm1, %v801_v29 }
 0x1aa   : > { %1431 = vrcp.f32 %v765_v61  ;;  %1350 = vmatmul.msk.f32.vlgmr.msrb.gmra.mxu1 %vm633_vm1, %v799_v49  ;;  %1369 = vmatpush.msk.msrb.mxu3 %vm813_vm2, %v1601_v28 }
 0x1ab   : > { %1348 = vmatmul.msk.f32.vlgmr.msrb.gmra.mxu0 %vm633_vm1, %v798_v22  ;;  %1365 = vmatpush.msk.msrb.mxu1 %vm813_vm2, %v1660_v45  ;;  %1433 = vrcp.f32 %v762_v33 }
 0x1ac   : > { %1206 = vmatpush.msrb.mxu3 %v1640_v37  ;;  %1363 = vmatpush.msk.msrb.mxu0 %vm813_vm2, %v1633_v36 }
 0x1ad   : > { %1156 = vmatpush.msrb.mxu1 %v1678_v47 }
 0x1ae   : > { %1131 = vmatpush.msrb.mxu0 %v1666_v46 }
 0x1af   : > { %v1430_v23 = vpop.eup %1429  ;;  %v759_v27 = vpop.xlane.xlu0 %758 }
 0x1b0   : > { %v756_v30 = vpop.xlane.xlu2 %755  ;;  %v1432_v52 = vpop.eup %1431  ;;  %v800_v28 = vmul.f32 %v1430_v23, %v1769_v63  ;;  %1435 = vrcp.f32 %v759_v27 }
 0x1b1   : > { %v805_v41 = vmul.f32 %v1432_v52, %v1776_v38  ;;  %1437 = vrcp.f32 %v756_v30  ;;  %v774_v45 = vpop.xlane.xlu1 %773  ;;  %v1434_v36 = vpop.eup %1433 }
 0x1b2   : > { %1352 = vmatmul.msk.f32.vlgmr.msrb.gmra.mxu2 %vm633_vm1, %v800_v28  ;;  %1439 = vrcp.f32 %v774_v45  ;;  %v804_v53 = vmul.f32 %v1434_v36, %v1773_v13 }
 0x1b3   : > { %1362 = vmatmul.msk.f32.vlgmr.msra.gmra.mxu3 %vm633_vm1, %v805_v41  ;;  %1367 = vmatpush.msk.msrb.mxu2 %vm813_vm2, %v1618_v32 }
 0x1b5   : > { %1181 = vmatpush.msrb.mxu2 %v1657_v43 }
 0x1b6   : > { %v1436_v37 = vpop.eup %1435 }
 0x1b7   : > { %v1438_v46 = vpop.eup %1437  ;;  %v803_v47 = vmul.f32 %v1436_v37, %v1788_v57 }
 0x1b8   : > { %v777_v48 = vpop.xlane.xlu2 %776  ;;  %v802_v63 = vmul.f32 %v1438_v46, %v1784_v50  ;;  %v768_v38 = vpop.xlane.xlu0 %767 }
 0x1b9   : > { %1441 = vrcp.f32 %v777_v48  ;;  %v771_v58 = vpop.xlane.xlu1 %770  ;;  %1358 = vmatmul.msk.f32.vlgmr.msra.gmra.mxu1 %vm633_vm1, %v803_v47  ;;  %v1440_v32 = vpop.eup %1439 }
 0x1ba   : > { %1443 = vrcp.f32 %v768_v38  ;;  %1356 = vmatmul.msk.f32.vlgmr.msra.gmra.mxu0 %vm633_vm1, %v802_v63  ;;  %1360 = vmatmul.msk.f32.vlgmr.msra.gmra.mxu2 %vm633_vm1, %v804_v53  ;;  %v808_v34 = vmul.f32 %v1440_v32, %v1790_v60 }
 0x1bb   : > { %1445 = vrcp.f32 %v771_v58 }
 0x1bf   : > { %v1442_v43 = vpop.eup %1441 }
 0x1c0   : > { %v1444_v35 = vpop.eup %1443  ;;  %v809_v31 = vmul.f32 %v1442_v43, %v1798_v40 }
 0x1c1   : > { %v1446_v13 = vpop.eup %1445  ;;  %v806_v16 = vmul.f32 %v1444_v35, %v1802_v12 }
 0x1c2   : > { %v807_v44 = vmul.f32 %v1446_v13, %v1800_v5  ;;  %1370 = vmatmul.msk.f32.vlgmr.msrb.gmra.mxu3 %vm633_vm1, %v809_v31  ;;  %1368 = vmatmul.msk.f32.vlgmr.msrb.gmra.mxu2 %vm633_vm1, %v808_v34 }
 0x1c3   : > { %1364 = vmatmul.msk.f32.vlgmr.msrb.gmra.mxu0 %vm633_vm1, %v806_v16 }
 0x1c4   : > { %1366 = vmatmul.msk.f32.vlgmr.msrb.gmra.mxu1 %vm633_vm1, %v807_v44 }
 0x20f   : > { %v833_v50 = vpop.f32.mrf.mxu0 }
 0x210   : > { %1211 = vst.msk [vmem:[%s1894_s6] sm:$0xff] %vm192_vm0, %v833_v50 }
 0x217   : > { %v858_v51 = vpop.f32.mrf.mxu1 }
 0x218   : > { %1212 = vst.msk [vmem:[%s1894_s6 + $0x8] sm:$0xff] %vm192_vm0, %v858_v51 }
 0x224   : > { %v908_v54 = vpop.f32.mrf.mxu3 }
 0x225   : > { %1214 = vst.msk [vmem:[%s1894_s6 + $0x18] sm:$0xff] %vm192_vm0, %v908_v54 }
 0x226   : > { %v883_v57 = vpop.f32.mrf.mxu2 }
 0x227   : > { %1213 = vst.msk [vmem:[%s1894_s6 + $0x10] sm:$0xff] %vm192_vm0, %v883_v57  ;;  %v958_v4 = vpop.f32.mrf.mxu1 }
 0x228   : > { %1216 = vst.msk [vmem:[%s1894_s6 + $0x28] sm:$0xff] %vm192_vm0, %v958_v4  ;;  %v933_v10 = vpop.f32.mrf.mxu0 }
 0x229   : > { %1215 = vst.msk [vmem:[%s1894_s6 + $0x20] sm:$0xff] %vm192_vm0, %v933_v10 }
 0x22c   : > { %v1008_v60 = vpop.f32.mrf.mxu3 }
 0x22d   : > { %1218 = vst.msk [vmem:[%s1894_s6 + $0x38] sm:$0xff] %vm192_vm0, %v1008_v60 }
 0x235   : > { %v983_v62 = vpop.f32.mrf.mxu2 }
 0x236   : > { %1217 = vst.msk [vmem:[%s1894_s6 + $0x30] sm:$0xff] %vm192_vm0, %v983_v62  ;;  %v1058_v56 = vpop.f32.mrf.mxu1  ;;  %v1108_v39 = vpop.f32.mrf.mxu3 }
 0x237   : > { %v1033_v40 = vpop.f32.mrf.mxu0  ;;  %1220 = vst.msk [vmem:[%s1894_s6 + $0x48] sm:$0xff] %vm192_vm0, %v1058_v56 }
 0x238   : > { %1219 = vst.msk [vmem:[%s1894_s6 + $0x40] sm:$0xff] %vm192_vm0, %v1033_v40 }
 0x239   : > { %1222 = vst.msk [vmem:[%s1894_s6 + $0x58] sm:$0xff] %vm192_vm0, %v1108_v39 }
 0x23d   : > { %v1083_v5 = vpop.f32.mrf.mxu2 }
 0x23e   : > { %1221 = vst.msk [vmem:[%s1894_s6 + $0x50] sm:$0xff] %vm192_vm0, %v1083_v5 }
 0x240   : > { %v1133_v12 = vpop.f32.mrf.mxu0 }
 0x241   : > { %1223 = vst.msk [vmem:[%s1894_s6 + $0x60] sm:$0xff] %vm192_vm0, %v1133_v12  ;;  %v1158_v59 = vpop.f32.mrf.mxu1 }
 0x242   : > { %1224 = vst.msk [vmem:[%s1894_s6 + $0x68] sm:$0xff] %vm192_vm0, %v1158_v59 }
 0x245   : > { %v1208_v55 = vpop.f32.mrf.mxu3  ;;  %v1183_v17 = vpop.f32.mrf.mxu2 }
 0x246   : > { %1226 = vst.msk [vmem:[%s1894_s6 + $0x78] sm:$0xff] %vm192_vm0, %v1208_v55 }
 0x247   : > { %1225 = vst.msk [vmem:[%s1894_s6 + $0x70] sm:$0xff] %vm192_vm0, %v1183_v17 }
 0x248 PF: > { %s12_s9 = sadd.s32 1, %s1453_s9  }
 0x249   : > { %p9_p4 = scmp.ge.s32.totalorder %s12_s9, 4  }
 0x24b   :  { %11 = sbr.rel (!%p9_p4) target bundleno = 1 (0x1), region = 58 }

// kernel: multi_head_attention_forward.5
= control target key start
LH: loop header
LB: loop body
LE: loop exit
PB: predicated region body
PF: predicated region fallthrough
CT: control target
= control target key end

     0   :  { %s149_s1 = inlined_call_operand.vmem [shape: f32[128,128], index: 1, kind: input, shape index: {}]   ;;  %s150_s0 = inlined_call_operand.vmem [shape: f32[16,128], index: 0, kind: input, shape index: {}]   ;;  %s151_s2 = inlined_call_operand.vmem [shape: f32[16,128], index: 2, kind: output, shape index: {}]  }
   0x1   :  { %v28_v0 = vld [vmem:[%s149_s1 + $0x78] sm:$0xff]  ;;  %v27_v1 = vld [vmem:[%s149_s1 + $0x70] sm:$0xff]  ;;  %v26_v2 = vld [vmem:[%s149_s1 + $0x68] sm:$0xff] }
   0x2   :  { %29 = vmatpush.msra.mxu0 %v28_v0  ;;  %58 = vmatpush.msra.mxu1 %v28_v0  ;;  %v25_v3 = vld [vmem:[%s149_s1 + $0x60] sm:$0xff]  ;;  %v24_v4 = vld [vmem:[%s149_s1 + $0x58] sm:$0xff]  ;;  %v23_v5 = vld [vmem:[%s149_s1 + $0x50] sm:$0xff] }
   0x3   :  { %v22_v6 = vld [vmem:[%s149_s1 + $0x48] sm:$0xff]  ;;  %v21_v7 = vld [vmem:[%s149_s1 + $0x40] sm:$0xff]  ;;  %v20_v8 = vld [vmem:[%s149_s1 + $0x38] sm:$0xff] }
   0x4   :  { %30 = vmatpush.msra.mxu0 %v27_v1  ;;  %59 = vmatpush.msra.mxu1 %v27_v1  ;;  %v19_v9 = vld [vmem:[%s149_s1 + $0x30] sm:$0xff]  ;;  %v18_v10 = vld [vmem:[%s149_s1 + $0x28] sm:$0xff]  ;;  %v17_v11 = vld [vmem:[%s149_s1 + $0x20] sm:$0xff] }
   0x5   :  { %v16_v12 = vld [vmem:[%s149_s1 + $0x18] sm:$0xff]  ;;  %v15_v13 = vld [vmem:[%s149_s1 + $0x10] sm:$0xff]  ;;  %v14_v14 = vld [vmem:[%s149_s1 + $0x8] sm:$0xff] }
   0x6   :  { %31 = vmatpush.msra.mxu0 %v26_v2  ;;  %60 = vmatpush.msra.mxu1 %v26_v2  ;;  %v13_v15 = vld [vmem:[%s149_s1] sm:$0xff]  ;;  %v12_v17 = vld [vmem:[%s150_s0 + $0x8] sm:$0xff] }
   0x7   :  { %v11_v16 = vld [vmem:[%s150_s0] sm:$0xff] }
   0x8   :  { %32 = vmatpush.msra.mxu0 %v25_v3  ;;  %61 = vmatpush.msra.mxu1 %v25_v3 }
   0xa   :  { %33 = vmatpush.msra.mxu0 %v24_v4  ;;  %62 = vmatpush.msra.mxu1 %v24_v4 }
   0xc   :  { %34 = vmatpush.msra.mxu0 %v23_v5  ;;  %63 = vmatpush.msra.mxu1 %v23_v5 }
   0xe   :  { %35 = vmatpush.msra.mxu0 %v22_v6  ;;  %64 = vmatpush.msra.mxu1 %v22_v6 }
  0x10   :  { %36 = vmatpush.msra.mxu0 %v21_v7  ;;  %65 = vmatpush.msra.mxu1 %v21_v7 }
  0x12   :  { %37 = vmatpush.msra.mxu0 %v20_v8  ;;  %66 = vmatpush.msra.mxu1 %v20_v8 }
  0x14   :  { %38 = vmatpush.msra.mxu0 %v19_v9  ;;  %67 = vmatpush.msra.mxu1 %v19_v9 }
  0x16   :  { %39 = vmatpush.msra.mxu0 %v18_v10  ;;  %68 = vmatpush.msra.mxu1 %v18_v10 }
  0x18   :  { %40 = vmatpush.msra.mxu0 %v17_v11  ;;  %69 = vmatpush.msra.mxu1 %v17_v11 }
  0x1a   :  { %41 = vmatpush.msra.mxu0 %v16_v12  ;;  %70 = vmatpush.msra.mxu1 %v16_v12 }
  0x1c   :  { %42 = vmatpush.msra.mxu0 %v15_v13  ;;  %71 = vmatpush.msra.mxu1 %v15_v13 }
  0x1e   :  { %43 = vmatpush.msra.mxu0 %v14_v14  ;;  %72 = vmatpush.msra.mxu1 %v14_v14 }
  0x20   :  { %44 = vmatpush.msra.mxu0 %v13_v15  ;;  %73 = vmatpush.msra.mxu1 %v13_v15 }
  0x21   :  { %45 = vmatmul.f32.vlgmr.msra.gmra.mxu0 %v11_v16  ;;  %48 = vmatmul.f32.vlgmr.msra.gmra.mxu1 %v12_v17 }
  0x9e   :  { %v46_v18 = vpop.f32.mrf.mxu0  ;;  %v49_v19 = vpop.f32.mrf.mxu1 }
  0x9f   :  { %52 = vst [vmem:[%s151_s2] sm:$0xff] %v46_v18 }
  0xa0   :  { %53 = vst [vmem:[%s151_s2 + $0x8] sm:$0xff] %v49_v19 }

</bundles_post_ra>
